<compile_context>
chip_gen: v6e
topology: v6e:2x2x1
jax: 0.10.0
libtpu: 0.0.40
codegen_flags: <defaults>
</compile_context>

<pallas_src>
import jax
import jax.numpy as jnp
from jax.experimental import pallas as pl
from jax.experimental.pallas import tpu as pltpu


# ---------------------------------------------------------------------------
# Kernels
# ---------------------------------------------------------------------------

def _exp_kernel_smem(log_t_ref, out_ref):
    """Pure scalar path: (1,) f32 SMEM in -> (1,) f32 SMEM out."""
    out_ref[0] = jnp.exp(log_t_ref[0])


def _exp_kernel_vmem(log_t_ref, out_ref):
    """Fallback: (1,) f32 SMEM in -> (1,1) f32 VMEM out via the EUP vector exp."""
    out_ref[...] = jnp.exp(jnp.full((1, 1), log_t_ref[0], dtype=jnp.float32))


# ---------------------------------------------------------------------------
# Forward wrappers — the full forward (reshape / pallas_call / squeeze) stays
# inside one jit so the scalar glue fuses with the custom call.
# ---------------------------------------------------------------------------

@jax.jit
def _forward_smem(log_temperature):
    log_t = jnp.reshape(log_temperature, (1,))      # SMEM scalars must be >=1-D
    out = pl.pallas_call(
        _exp_kernel_smem,
        out_shape=jax.ShapeDtypeStruct((1,), jnp.float32),
        in_specs=[pl.BlockSpec(memory_space=pltpu.SMEM)],
        out_specs=pl.BlockSpec(memory_space=pltpu.SMEM),
    )(log_t)
    return out[0]                                    # back to 0-dim, fused in-jit


@jax.jit
def _forward_vmem(log_temperature):
    log_t = jnp.reshape(log_temperature, (1,))
    out = pl.pallas_call(
        _exp_kernel_vmem,
        out_shape=jax.ShapeDtypeStruct((1, 1), jnp.float32),
        in_specs=[pl.BlockSpec(memory_space=pltpu.SMEM)],
        out_specs=pl.BlockSpec(memory_space=pltpu.VMEM),
    )(log_t)
    return out[0, 0]


def temperature_holder_forward_reference(log_temperature):
    """Recommended production path: no kernel at all (let XLA fuse the exp)."""
    return jnp.exp(log_temperature)


# ---------------------------------------------------------------------------
# One-time implementation selection: prefer the SMEM-in/SMEM-out scalar
# kernel; if Mosaic rejects the scalar-path exp lowering (or mis-lowers it),
# fall back to the previously-validated VMEM-tile kernel.
# ---------------------------------------------------------------------------

_FORWARD_IMPL = None


def _pick_impl(example_log_t):
    ref = jnp.exp(example_log_t)
    try:
        val = jax.block_until_ready(_forward_smem(example_log_t))
        if val.shape == () and bool(jnp.allclose(val, ref, rtol=1e-6, atol=1e-6)):
            return _forward_smem
    except Exception:
        pass
    return _forward_vmem


def temperature_holder_forward(log_temperature):
    """Pallas equivalent of TemperatureHolder.forward(): exp(log_temperature)."""
    global _FORWARD_IMPL
    log_temperature = jnp.asarray(log_temperature, dtype=jnp.float32)
    if _FORWARD_IMPL is None:
        _FORWARD_IMPL = _pick_impl(log_temperature)
    return _FORWARD_IMPL(log_temperature)


if __name__ == "__main__":
    # Deterministic parameter mirroring __init__(initial_log_temperature=0),
    # plus a tiny PRNGKey(0) perturbation so the exp is non-trivial.
    key = jax.random.PRNGKey(0)
    initial_log_temperature = jnp.float32(0.0)
    log_temperature = initial_log_temperature + 0.1 * jax.random.normal(
        key, (), dtype=jnp.float32
    )

    temperature = temperature_holder_forward(log_temperature)
    temperature = jax.block_until_ready(temperature)

    # Check against the plain-JAX reference (the recommended production path).
    ref = temperature_holder_forward_reference(log_temperature)
    assert temperature.shape == ()
    assert temperature.dtype == jnp.float32
    assert jnp.allclose(temperature, ref, rtol=1e-6, atol=1e-6)

    print("KERNEL_OK")
</pallas_src>

<mosaic_0001>
module attributes {stable_mosaic.version = 11 : i64} {
  func.func @_exp_kernel_smem(%arg0: memref<1xf32, #tpu.memory_space<smem>>, %arg1: memref<1xf32, #tpu.memory_space<smem>>) attributes {dimension_semantics = [], scalar_prefetch = 0 : i64, scratch_operands = 0 : i64, tpu.core_type = #tpu.core_type<tc>} {
    %c0 = arith.constant 0 : index
    %0 = memref.load %arg0[%c0] : memref<1xf32, #tpu.memory_space<smem>>
    %1 = math.exp %0 : f32
    %c0_0 = arith.constant 0 : index
    %2 = memref.load %arg1[%c0_0] : memref<1xf32, #tpu.memory_space<smem>>
    memref.store %1, %arg1[%c0_0] : memref<1xf32, #tpu.memory_space<smem>>
    return
  }
}

module attributes {stable_mosaic.version = 11 : i64} {
  func.func @_exp_kernel_vmem(%arg0: memref<1xf32, #tpu.memory_space<smem>>, %arg1: memref<1x1xf32, #tpu.memory_space<vmem>>) attributes {dimension_semantics = [], scalar_prefetch = 0 : i64, scratch_operands = 0 : i64, tpu.core_type = #tpu.core_type<tc>} {
    %c0 = arith.constant 0 : index
    %0 = memref.load %arg0[%c0] : memref<1xf32, #tpu.memory_space<smem>>
    %1 = vector.broadcast %0 : f32 to vector<1x1xf32>
    %2 = math.exp %1 : vector<1x1xf32>
    %c0_0 = arith.constant 0 : index
    %c0_1 = arith.constant 0 : index
    %3 = vector.load %arg1[%c0_0, %c0_1] : memref<1x1xf32, #tpu.memory_space<vmem>>, vector<1x1xf32>
    tpu.vector_store %arg1[%c0_0, %c0_1], %2 {strides = array<i32>} : memref<1x1xf32, #tpu.memory_space<vmem>>, vector<1x1xf32>,
    return
  }
}

</mosaic_0001>

<bundles_post_ra>
// kernel: _forward_smem.1
= control target key start
LH: loop header
LB: loop body
LE: loop exit
PB: predicated region body
PF: predicated region fallthrough
CT: control target
= control target key end

     0   :  { %s62_s0 = inlined_call_operand.<no memory space> [shape: f32[1], index: 0, kind: input, shape index: {}]   ;;  %s63_s1 = inlined_call_operand.hbm [shape: f32[1], index: 1, kind: output, shape index: {}]  }
   0x1   :  { %v11_v0 = vstv %s62_s0 }
   0x2   :  { %7 = vsyncpa [#allocation4], 0  ;;  %v12_v1 = vmul.f32 1.442695, %v11_v0  ;;  %s45_s9 = smov [#allocation3]  }
   0x4   :  { %33 = vpow2.f32 %v12_v1 }
  0x11   :  { %v34_v2 = vpop.eup %33 }
  0x12   :  { %30 = vpush %v34_v2 }
  0x43   :  { %s31_s8 = spop %30 }
  0x44   :  { %16 = sst [smem:[#allocation3]] %s31_s8 }
  0x45   :  { %24 = dma.smem_to_hbm %s45_s9, 16, %s63_s1, [#allocation4]  }
  0x46   :  { %43 = dma.done.wait [#allocation4], 16  }
  0x47   :  { %44 = vsyncadd [#allocation4], 4294967280 }
  0x48   :  { %28 = sfence }
  0x49   :  { %29 = vsyncpa [#allocation4], 1 }

// kernel: _forward_vmem.1
= control target key start
LH: loop header
LB: loop body
LE: loop exit
PB: predicated region body
PF: predicated region fallthrough
CT: control target
= control target key end

     0   :  { %s72_s0 = inlined_call_operand.<no memory space> [shape: f32[1], index: 0, kind: input, shape index: {}]   ;;  %s73_s1 = inlined_call_operand.hbm [shape: f32[1,1], index: 1, kind: output, shape index: {}]  }
   0x1   :  { %v11_v0 = vstv %s72_s0 }
   0x2   :  { %7 = vsyncpa [#allocation4], 0  ;;  %v12_v1 = vmul.f32 1.442695, %v11_v0  ;;  %s55_s8 = smov [#allocation3]   ;;  %vm14_vm0 = vcmask 0  }
   0x3   :  { %s22_s9 = sshll.u32 %s55_s8, 4  ;;  %s23_s9 = int_to_ptr.vmem [resolvable:$true] %s22_s9 }
   0x4   :  { %31 = vpow2.f32 %v12_v1  ;;  %s33_s10 = scalar_lea.vmem %s23_s9, 16  ;;  %s37_s11 = scalar_lea.vmem %s23_s9, 32 }
   0x5   :  { %p34_p0 = scmp.ne.s32.totalorder %s23_s9, %s33_s10  ;;  %p38_p1 = scmp.lt.s32.totalorder %s23_s9, %s23_s9 }
   0x6   :  { %p39_p2 = scmp.lt.s32.totalorder %s37_s11, %s33_s10 }
   0x8   :  { %p40_p3 = por %p39_p2, %p38_p1 }
   0xa   :  { %p41_p4 = pnand %p40_p3, %p34_p0 }
  0x11   :  { %v32_v2 = vpop.eup %31 }
  0x12   :  { %15 = vst.msk [vmem:[#allocation3] sm:$0x1] %vm14_vm0, %v32_v2 }
  0x13   :  { %44 = shalt.err (!%p41_p4)
}
  0x14   :  { %25 = dma.vmem_to_hbm [thread:$0]  %s23_s9, 16, %s73_s1, [#allocation4]  }
  0x15   :  { %53 = dma.done.wait [#allocation4], 16  }
  0x16   :  { %54 = vsyncadd [#allocation4], 4294967280 }
  0x17   :  { %29 = vsyncpa [#allocation4], 1 }

</bundles_post_ra>
